<compile_context>
chip_gen: v6e
topology: v6e:2x2x1
jax: 0.10.0
libtpu: 0.0.40
codegen_flags: <defaults>
</compile_context>

<pallas_src>
import math

import jax
import jax.numpy as jnp
from jax.experimental import pallas as pl
from jax.experimental.pallas import tpu as pltpu


def _round_up(x, m):
    return ((x + m - 1) // m) * m


def _make_gcn_kernel(N, TK, mask_tail_k):
    """Build the kernel body; N / TK / mask_tail_k are static Python values."""

    def kernel(x_ref, adj_ref, w_ref, b_ref, o_ref, acc_ref):
        # x_ref:   (TK, Fin)        K-slice of node features for this batch elem
        # adj_ref: (TM, TK)         row/col tile of adjacency (possibly bf16)
        # w_ref:   (Fin, Fout_pad)  shared weight (lane-padded)
        # b_ref:   (1,  Fout_pad)   shared bias   (lane-padded)
        # o_ref:   (TM, Fout_pad)   output row tile
        # acc_ref: (TM, Fout_pad)   f32 accumulator scratch
        k = pl.program_id(2)

        @pl.when(k == 0)
        def _():
            acc_ref[...] = jnp.zeros_like(acc_ref)

        x_blk = x_ref[...]
        adj_blk = adj_ref[...]
        if mask_tail_k:
            # Tail K tile extends past N: the out-of-range VMEM contents are
            # undefined (Pallas does not zero them), so zero the out-of-range
            # x rows and adj columns.  Cheap VPU work; kernel is HBM-bound.
            row_ids = k * TK + jax.lax.broadcasted_iota(jnp.int32, x_blk.shape, 0)
            x_blk = jnp.where(row_ids < N, x_blk, 0)
            col_ids = k * TK + jax.lax.broadcasted_iota(jnp.int32, adj_blk.shape, 1)
            adj_blk = jnp.where(col_ids < N, adj_blk, 0)

        # support slice for this K tile (cheap: K=Fin MXU push), f32 accumulate.
        support = jnp.dot(x_blk, w_ref[...], preferred_element_type=jnp.float32)
        # Match adj dtype (bf16 fast path when adj streamed as bf16); f32 acc.
        acc_ref[...] += jnp.dot(adj_blk, support.astype(adj_blk.dtype),
                                preferred_element_type=jnp.float32)

        @pl.when(k == pl.num_programs(2) - 1)
        def _():
            o_ref[...] = (acc_ref[...] + b_ref[...]).astype(o_ref.dtype)

    return kernel


def graph_convolution(x, adj, weight, bias=None, *, tile=512,
                      cast_adj_to_bf16=True):
    """Batched GCN forward via Pallas.

    x: (B, N, Fin), adj: (B, N, N), weight: (Fin, Fout), bias: (Fout,) or None.
    Returns (B, N, Fout).
    """
    B, N, Fin = x.shape
    Fin_w, Fout = weight.shape
    assert Fin_w == Fin, "weight/in_features mismatch"

    # Lane-dense output: pad Fout (and weight/bias) to a multiple of 128.
    Fout_pad = _round_up(Fout, 128)

    # Stream adj as bf16 (f32 accumulation in-kernel) to halve its HBM bytes.
    if cast_adj_to_bf16 and adj.dtype == jnp.float32:
        adj = adj.astype(jnp.bfloat16)

    # ---- tile selection -----------------------------------------------------
    if N <= tile:
        TK = N            # single K step; block dims equal full array dims
        TM = N
        if B == 1 and N >= 16:
            # v7x has 2 TensorCores: give the "parallel" grid >= 2 row tiles.
            TM = _round_up(pl.cdiv(N, 2), 8)
    else:
        TM = TK = tile    # N > tile  =>  >= 2 row tiles automatically

    grid = (B, pl.cdiv(N, TM), pl.cdiv(N, TK))
    mask_tail_k = (N % TK) != 0

    # ---- small parameter padding (no padding of the big N x N adj!) --------
    if bias is None:
        bias2d = jnp.zeros((1, Fout_pad), dtype=weight.dtype)
    else:
        bias2d = bias.reshape(1, Fout)
        if Fout_pad != Fout:
            bias2d = jnp.pad(bias2d, ((0, 0), (0, Fout_pad - Fout)))
    if Fout_pad != Fout:
        weight = jnp.pad(weight, ((0, 0), (0, Fout_pad - Fout)))

    kernel = _make_gcn_kernel(N, TK, mask_tail_k)

    out = pl.pallas_call(
        kernel,
        out_shape=jax.ShapeDtypeStruct((B, N, Fout_pad), x.dtype),
        grid_spec=pltpu.PrefetchScalarGridSpec(
            num_scalar_prefetch=0,
            grid=grid,
            in_specs=[
                # x: K-slice of features for batch b
                pl.BlockSpec((pl.Squeezed(), TK, Fin), lambda b, i, k: (b, k, 0)),
                # adj: (row tile i, col tile k) for batch b (dominant stream)
                pl.BlockSpec((pl.Squeezed(), TM, TK), lambda b, i, k: (b, i, k)),
                # weight / bias: shared across the whole grid
                pl.BlockSpec((Fin, Fout_pad), lambda b, i, k: (0, 0)),
                pl.BlockSpec((1, Fout_pad), lambda b, i, k: (0, 0)),
            ],
            out_specs=pl.BlockSpec((pl.Squeezed(), TM, Fout_pad),
                                   lambda b, i, k: (b, i, 0)),
            scratch_shapes=[pltpu.VMEM((TM, Fout_pad), jnp.float32)],
        ),
        compiler_params=pltpu.CompilerParams(
            # batch + row tiles are independent (megacore / v7x 2 TCs);
            # K is the reduction axis for the resident accumulator.
            dimension_semantics=("parallel", "parallel", "arbitrary"),
        ),
    )(x, adj, weight, bias2d)

    # Only slice when lane padding actually occurred (avoids a needless copy).
    if Fout_pad != Fout:
        out = out[..., :Fout]
    return out


if __name__ == "__main__":
    key = jax.random.PRNGKey(0)

    def make_inputs(k, B, N, Fin, Fout):
        kx, kadj, kw, kb = jax.random.split(k, 4)
        x = jax.random.normal(kx, (B, N, Fin), dtype=jnp.float32)
        adj_raw = jax.random.uniform(kadj, (B, N, N), dtype=jnp.float32)
        adj = (adj_raw + jnp.swapaxes(adj_raw, -1, -2)) * 0.5
        adj = adj / jnp.sum(adj, axis=-1, keepdims=True)
        stdv = 1.0 / math.sqrt(Fout)
        w = jax.random.uniform(kw, (Fin, Fout), dtype=jnp.float32,
                               minval=-stdv, maxval=stdv)
        b = jax.random.uniform(kb, (Fout,), dtype=jnp.float32,
                               minval=-stdv, maxval=stdv)
        return x, adj, w, b

    # 1) Small shapes consistent with the module (single-tile path), exact f32.
    B, N, Fin, Fout = 2, 16, 8, 32
    x, adj, w, b = make_inputs(key, B, N, Fin, Fout)
    out = jax.block_until_ready(
        graph_convolution(x, adj, w, b, cast_adj_to_bf16=False))
    ref = jnp.matmul(adj, jnp.matmul(x, w)) + b
    assert out.shape == (B, N, Fout)
    assert jnp.allclose(out, ref, atol=1e-5, rtol=1e-5), "mismatch (small)"

    # 1b) no-bias path
    out_nb = jax.block_until_ready(
        graph_convolution(x, adj, w, None, cast_adj_to_bf16=False))
    ref_nb = jnp.matmul(adj, jnp.matmul(x, w))
    assert jnp.allclose(out_nb, ref_nb, atol=1e-5, rtol=1e-5), "mismatch (no bias)"

    # 2) B == 1 row-split path (v7x 2-TC parallelism), still exact f32.
    B2, N2 = 1, 384
    x2, adj2, w2, b2 = make_inputs(jax.random.PRNGKey(1), B2, N2, Fin, Fout)
    out2 = jax.block_until_ready(
        graph_convolution(x2, adj2, w2, b2, cast_adj_to_bf16=False))
    ref2 = jnp.matmul(adj2, jnp.matmul(x2, w2)) + b2
    assert out2.shape == (B2, N2, Fout)
    assert jnp.allclose(out2, ref2, atol=1e-4, rtol=1e-4), "mismatch (row-split)"

    # 3) Tiled path with non-multiple N (in-kernel tail masking, no adj pad)
    #    and bf16 adj streaming (default); looser tolerance for bf16 adj.
    B3, N3 = 1, 600
    x3, adj3, w3, b3 = make_inputs(jax.random.PRNGKey(2), B3, N3, Fin, Fout)
    out3 = jax.block_until_ready(
        graph_convolution(x3, adj3, w3, b3, tile=256))
    ref3 = jnp.matmul(adj3, jnp.matmul(x3, w3)) + b3
    assert out3.shape == (B3, N3, Fout)
    assert jnp.allclose(out3, ref3, atol=1e-2, rtol=1e-2), "mismatch (tiled+masked)"

    print("KERNEL_OK")
</pallas_src>

<mosaic_0001>
module attributes {stable_mosaic.version = 11 : i64} {
  func.func @kernel(%arg0: i32, %arg1: i32, %arg2: i32, %arg3: memref<1x16x8xf32, #tpu.memory_space<vmem>>, %arg4: memref<1x16x16xf32, #tpu.memory_space<vmem>>, %arg5: memref<8x128xf32, #tpu.memory_space<vmem>>, %arg6: memref<1x128xf32, #tpu.memory_space<vmem>>, %arg7: memref<1x16x128xf32, #tpu.memory_space<vmem>>, %arg8: memref<16x128xf32, #tpu.memory_space<vmem>>) attributes {dimension_semantics = [#tpu.dimension_semantics<parallel>, #tpu.dimension_semantics<parallel>, #tpu.dimension_semantics<arbitrary>], iteration_bounds = array<i64: 2, 1, 1>, scalar_prefetch = 0 : i64, scratch_operands = 1 : i64, tpu.core_type = #tpu.core_type<tc>, window_params = [{transform_indices = @transform_0, window_bounds = array<i64: 1, 16, 8>}, {transform_indices = @transform_1, window_bounds = array<i64: 1, 16, 16>}, {pipeline_mode = #tpu.pipeline_mode<synchronous>, transform_indices = @transform_2, window_bounds = array<i64: 8, 128>}, {pipeline_mode = #tpu.pipeline_mode<synchronous>, transform_indices = @transform_3, window_bounds = array<i64: 1, 128>}, {transform_indices = @transform_4, window_bounds = array<i64: 1, 16, 128>}]} {
    %c0_i32 = arith.constant 0 : i32
    %0 = arith.cmpi eq, %arg2, %c0_i32 : i32
    %1 = arith.extui %0 : i1 to i32
    %c0_i32_0 = arith.constant 0 : i32
    %2 = arith.cmpi ne, %1, %c0_i32_0 : i32
    scf.if %2 {
      %cst_15 = arith.constant 0.000000e+00 : f32
      %16 = vector.broadcast %cst_15 : f32 to vector<16x128xf32>
      %c0_16 = arith.constant 0 : index
      %c0_17 = arith.constant 0 : index
      %17 = vector.load %arg8[%c0_16, %c0_17] : memref<16x128xf32, #tpu.memory_space<vmem>>, vector<16x128xf32>
      tpu.vector_store %arg8[%c0_16, %c0_17], %16 {strides = array<i32>} : memref<16x128xf32, #tpu.memory_space<vmem>>, vector<16x128xf32>,
    } else {
    }
    %c0 = arith.constant 0 : index
    %c0_1 = arith.constant 0 : index
    %c0_2 = arith.constant 0 : index
    %3 = vector.load %arg3[%c0, %c0_1, %c0_2] : memref<1x16x8xf32, #tpu.memory_space<vmem>>, vector<1x16x8xf32>
    %4 = vector.shape_cast %3 : vector<1x16x8xf32> to vector<16x8xf32>
    %c0_3 = arith.constant 0 : index
    %c0_4 = arith.constant 0 : index
    %c0_5 = arith.constant 0 : index
    %5 = vector.load %arg4[%c0_3, %c0_4, %c0_5] : memref<1x16x16xf32, #tpu.memory_space<vmem>>, vector<1x16x16xf32>
    %6 = vector.shape_cast %5 : vector<1x16x16xf32> to vector<16x16xf32>
    %c0_6 = arith.constant 0 : index
    %c0_7 = arith.constant 0 : index
    %7 = vector.load %arg5[%c0_6, %c0_7] : memref<8x128xf32, #tpu.memory_space<vmem>>, vector<8x128xf32>
    %cst = arith.constant dense<0.000000e+00> : vector<16x128xf32>
    %8 = tpu.matmul %4, %7, %cst {dimension_numbers = #tpu.dot_dimension_numbers<[1], [0], [0], [1], [0, 0, 1, 1], [], []>} : vector<16x8xf32>, vector<8x128xf32>, vector<16x128xf32> -> vector<16x128xf32>
    %c0_8 = arith.constant 0 : index
    %c0_9 = arith.constant 0 : index
    %9 = vector.load %arg8[%c0_8, %c0_9] : memref<16x128xf32, #tpu.memory_space<vmem>>, vector<16x128xf32>
    %cst_10 = arith.constant dense<0.000000e+00> : vector<16x128xf32>
    %10 = tpu.matmul %6, %8, %cst_10 {dimension_numbers = #tpu.dot_dimension_numbers<[1], [0], [0], [1], [0, 0, 1, 1], [], []>} : vector<16x16xf32>, vector<16x128xf32>, vector<16x128xf32> -> vector<16x128xf32>
    %11 = arith.addf %9, %10 : vector<16x128xf32>
    %c0_11 = arith.constant 0 : index
    %c0_12 = arith.constant 0 : index
    %12 = vector.load %arg8[%c0_11, %c0_12] : memref<16x128xf32, #tpu.memory_space<vmem>>, vector<16x128xf32>
    tpu.vector_store %arg8[%c0_11, %c0_12], %11 {strides = array<i32>} : memref<16x128xf32, #tpu.memory_space<vmem>>, vector<16x128xf32>,
    %c0_i32_13 = arith.constant 0 : i32
    %13 = arith.cmpi eq, %arg2, %c0_i32_13 : i32
    %14 = arith.extui %13 : i1 to i32
    %c0_i32_14 = arith.constant 0 : i32
    %15 = arith.cmpi ne, %14, %c0_i32_14 : i32
    scf.if %15 {
      %c0_15 = arith.constant 0 : index
      %c0_16 = arith.constant 0 : index
      %16 = vector.load %arg8[%c0_15, %c0_16] : memref<16x128xf32, #tpu.memory_space<vmem>>, vector<16x128xf32>
      %c0_17 = arith.constant 0 : index
      %c0_18 = arith.constant 0 : index
      %17 = vector.load %arg6[%c0_17, %c0_18] : memref<1x128xf32, #tpu.memory_space<vmem>>, vector<1x128xf32>
      %18 = vector.broadcast %17 : vector<1x128xf32> to vector<16x128xf32>
      %19 = arith.addf %16, %18 : vector<16x128xf32>
      %c0_19 = arith.constant 0 : index
      %c0_20 = arith.constant 0 : index
      %c0_21 = arith.constant 0 : index
      %20 = vector.load %arg7[%c0_19, %c0_20, %c0_21] : memref<1x16x128xf32, #tpu.memory_space<vmem>>, vector<1x16x128xf32>
      %21 = vector.shape_cast %20 : vector<1x16x128xf32> to vector<16x128xf32>
      %22 = vector.shape_cast %19 : vector<16x128xf32> to vector<1x16x128xf32>
      tpu.vector_store %arg7[%c0_19, %c0_20, %c0_21], %22 {strides = array<i32>} : memref<1x16x128xf32, #tpu.memory_space<vmem>>, vector<1x16x128xf32>,
    } else {
    }
    return
  }
  func.func @transform_0(%arg0: i32, %arg1: i32, %arg2: i32) -> (i32, i32, i32) {
    %c0_i32 = arith.constant 0 : i32
    %c0_i32_0 = arith.constant 0 : i32
    return %arg0, %arg2, %c0_i32 : i32, i32, i32
  }
  func.func @transform_1(%arg0: i32, %arg1: i32, %arg2: i32) -> (i32, i32, i32) {
    %c0_i32 = arith.constant 0 : i32
    return %arg0, %arg1, %arg2 : i32, i32, i32
  }
  func.func @transform_2(%arg0: i32, %arg1: i32, %arg2: i32) -> (i32, i32) {
    %c0_i32 = arith.constant 0 : i32
    %c0_i32_0 = arith.constant 0 : i32
    %c0_i32_1 = arith.constant 0 : i32
    return %c0_i32, %c0_i32_0 : i32, i32
  }
  func.func @transform_3(%arg0: i32, %arg1: i32, %arg2: i32) -> (i32, i32) {
    %c0_i32 = arith.constant 0 : i32
    %c0_i32_0 = arith.constant 0 : i32
    %c0_i32_1 = arith.constant 0 : i32
    return %c0_i32, %c0_i32_0 : i32, i32
  }
  func.func @transform_4(%arg0: i32, %arg1: i32, %arg2: i32) -> (i32, i32, i32) {
    %c0_i32 = arith.constant 0 : i32
    %c0_i32_0 = arith.constant 0 : i32
    return %arg0, %arg1, %c0_i32 : i32, i32, i32
  }
}

</mosaic_0001>

<bundles_post_ra>
// kernel: tpu_custom_call.1
= control target key start
LH: loop header
LB: loop body
LE: loop exit
PB: predicated region body
PF: predicated region fallthrough
CT: control target
= control target key end

     0   :  { %9 = vsyncpa [#allocation4], 0  ;;  %s925_s0 = inlined_call_operand.vmem [shape: f32[2,16,8], index: 0, kind: input, shape index: {}]   ;;  %s926_s1 = inlined_call_operand.vmem [shape: f32[2,16,16], index: 1, kind: input, shape index: {}]   ;;  %s927_s2 = inlined_call_operand.vmem [shape: f32[8,128], index: 2, kind: input, shape index: {}]   ;;  %s928_s3 = inlined_call_operand.vmem [shape: f32[1,128], index: 3, kind: input, shape index: {}]   ;;  %s929_s4 = inlined_call_operand.hbm [shape: f32[2,16,128], index: 4, kind: output, shape index: {}]  }
   0x1   :  { %11 = vsyncpa [#allocation4 + $0x1], 0  ;;  %s802_s15 = smov 0   ;;  %s804_s16 = smov 0  }
   0x2   :  { %s806_s17 = smov 0   ;;  %s808_s18 = smov 0  }
   0x3   :  { %s810_s19 = smov 0   ;;  %s812_s20 = smov 0  }
   0x4 LB: > { %s597_s21 = sadd.s32 4294967295, %s772_s20   ;;  %s598_s22 = sadd.s32 4294967294, %s772_s20   ;;  %s772_s20 = sphi %s812_s20, %s17_s20   ;;  %s768_s19 = sphi %s810_s19, %s936_s19   ;;  %s764_s18 = sphi %s808_s18, %s935_s18   ;;  %s760_s17 = sphi %s806_s17, %s934_s17   ;;  %s756_s16 = sphi %s804_s16, %s933_s16   ;;  %s752_s15 = sphi %s802_s15, %s932_s15  }
   0x5   : > { %s36_s23 = sadd.s32 1, %s768_s19  ;;  %s145_s24 = sadd.s32 1, %s760_s17 }
   0x6   : > { %p38_p0 = scmp.ge.s32.totalorder %s36_s23, 2  ;;  %p155_p1 = scmp.ne.s32.totalorder %s760_s17, %s756_s16 }
   0x7   : > { %p156_p2 = scmp.eq.s32.totalorder %s597_s21, 1  ;;  %p161_p3 = scmp.ne.s32.totalorder %s756_s16, %s752_s15 }
   0x8   : > { %s938_s23 = smov (%p38_p0, %s36_s23), 0  ;;  %p162_p5 = scmp.eq.s32.totalorder %s598_s22, 1 }
   0x9   : > { %p842_p4 = por %p156_p2, %p155_p1  ;;  %s140_s26 = ssub.s32 %s768_s19, %s938_s23 }
   0xa   : > { %p601_p6 = scmp.ge.s32.totalorder %s772_s20, 1  ;;  %p143_p7 = scmp.eq.s32.totalorder %s140_s26, 0 }
   0xb   : > { %p849_p8 = por %p162_p5, %p161_p3  ;;  %p215_p9 = scmp.lt.s32.totalorder %s772_s20, 3 }
   0xc   : > { %s855_s28 = scalar_select %p143_p7, %s760_s17, %s145_s24  }
   0xd   : > { %p216_p10 = pnand %p601_p6, %p215_p9 }
   0xe   : > { %p258_p11 = scmp.lt.s32.totalorder (!%p216_p10), %s764_s18, 1  ;;  %s254_s13 = sand.u32 (!%p216_p10), 1, %s756_s16  }
   0xf   : > { %219 = sbr.rel (%p216_p10) target bundleno = 434 (0x1b2), region = 36  ;;  %s602_s14 = sshll.u32 (!%p216_p10), %s254_s13, 4 }
  0x10   : > { %s256_s24 = scalar_lea.vmem (!%p216_p10), [#allocation3], %s602_s14  ;;  %s619_s29 = sshll.u32 (!%p216_p10), %s764_s18, 8 }
  0x11   : > { %s494_s26 = sshll.u32 (!%p216_p10), %s256_s24, 4  ;;  %s880_s7 = scalar_lea.sflag (!%p216_p10), [#allocation4], %s254_s13  ;;  %s873_s26 = int_to_ptr.vmem [resolvable:$true] %s494_s26 }
  0x12   : > { %s696_s8 = scalar_lea.vmem (!%p216_p10), %s873_s26, 256 }
  0x13   : > { %p697_p12 = scmp.ne.s32.totalorder (!%p216_p10), %s873_s26, %s696_s8 }
  0x14   : > { %v291_v0 = vld [vmem:[%s927_s2] sm:$0xff]  ;;  %s259_s5 = scalar_select %p258_p11, %s764_s18, 1  ;;  %vm292_vm0 = vcmask 64512   ;;  %vm376_vm1 = vcmask 130048  }
  0x15   : > { %627 = vmatprep.subr.mxu0 %v291_v0  ;;  %v611_v7 = vld [vmem:[%s928_s3] ss:$0 sm:$0xff]  ;;  %p698_p13 = pnand %p697_p12, %p842_p4  ;;  %s774_s18 = smov [#allocation3]  }
  0x16   : > { %628 = vmatpush3.msra.mxu0 %v291_v0  ;;  %s617_s6 = sshll.u32 %s259_s5, 4 }
  0x17   : > { %s265_s9 = scalar_lea.vmem %s925_s0, %s617_s6  ;;  %s278_s12 = scalar_lea.vmem %s926_s1, %s617_s6 }
  0x18   : > { %v287_v1 = vld [vmem:[%s265_s9] sm:$0xff]  ;;  %v288_v2 = vld [vmem:[%s265_s9 + $0x8] sm:$0xff]  ;;  %s878_s6 = scalar_lea.hbm %s929_s4, %s619_s29  ;;  %p699_p0 = pneg %p698_p13 }
  0x19   : > { %629 = vmatprep.mubr.msk.f32.mxu0 %vm292_vm0, %v287_v1  ;;  %v289_v3 = vld [vmem:[%s278_s12] sm:$0xff]  ;;  %v290_v6 = vld [vmem:[%s278_s12 + $0x8] sm:$0xff]  ;;  %s700_s9 = sshll.u32 %s774_s18, 4  ;;  %s701_s9 = int_to_ptr.vmem [resolvable:$false] %s700_s9 }
  0x1a   : > { %630 = vmatmul.mubr.msk.f32.vlgmr.msra.gmra.mxu0 %vm292_vm0, %v288_v2  ;;  %636 = vmatprep.mubr.msk.f32.mxu1 %vm376_vm1, %v289_v3  ;;  %s702_s10 = scalar_lea.vmem %s701_s9, 512  ;;  %p703_p1 = scmp.lt.s32.totalorder %s873_s26, %s701_s9 }
  0x1b   : > { %p704_p2 = scmp.lt.s32.totalorder %s702_s10, %s696_s8 }
  0x1d   : > { %p705_p3 = por %p704_p2, %p703_p1 }
  0x1f   : > { %p706_p5 = pnand %p705_p3, %p699_p0 }
  0xda   : > { %v631_v4 = vpop.f32.mrf.mxu0 }
  0xdb   : > { %632 = vmatprep.subr.mxu1 %v631_v4 }
  0xdc   : > { %v365_v5 = vpop.f32.mrf.mxu0  ;;  %633 = vmatpush3.msra.mxu1 %v631_v4 }
  0xdd   : > { %634 = vmatprep.subr.mxu1 %v365_v5 }
  0xde   : > { %635 = vmatpush3.msra.mxu1 %v365_v5 }
  0xdf   : > { %637 = vmatmul.mubr.msk.f32.vlgmr.msra.gmra.mxu1 %vm376_vm1, %v290_v6 }
 0x19f   : > { %v638_v8 = vpop.f32.mrf.mxu1 }
 0x1a0   : > { %v475_v9 = vadd.f32 %v638_v8, %v611_v7 }
 0x1a1   : > { %v449_v10 = vpop.f32.mrf.mxu1 }
 0x1a2   : > { %477 = vst [vmem:[%s256_s24 + $0x8] sm:$0xff] %v475_v9  ;;  %v474_v11 = vadd.f32 %v611_v7, %v449_v10 }
 0x1a4   : > { %476 = vst [vmem:[%s256_s24] sm:$0xff] %v474_v11 }
 0x1a5   : > { %709 = shalt.err (!%p706_p5)
}
 0x1a6   : > { %s710_s11 = scalar_lea.hbm %s878_s6, 256  ;;  %s714_s14 = scalar_lea.hbm %s929_s4, 512 }
 0x1a7   : > { %p711_p6 = scmp.ne.s32.totalorder %s878_s6, %s710_s11  ;;  %p715_p10 = scmp.lt.s32.totalorder %s878_s6, %s929_s4 }
 0x1a8   : > { %p716_p11 = scmp.lt.s32.totalorder %s714_s14, %s710_s11 }
 0x1a9   : > { %p712_p7 = pnand %p711_p6, %p842_p4 }
 0x1aa   : > { %p717_p12 = por %p716_p11, %p715_p10 }
 0x1ab   : > { %p713_p9 = pneg %p712_p7 }
 0x1ad   : > { %p718_p13 = pnand %p717_p12, %p713_p9 }
 0x1af   : > { %721 = shalt.err (!%p718_p13)
}
 0x1b0   : > { %s775_s24 = smov 128   ;;  %s776_s29 = smov 8  }
 0x1b1   : > { %639 = dma.vmem_to_hbm [thread:$0]  (%p842_p4), %s873_s26, 256, %s878_s6, %s880_s7, %s775_s24, %s775_s24, %s776_s29  }
 0x1b2 PF: > { %p645_p0 = scmp.ge.s32.totalorder %s772_s20, 2  ;;  %s509_s30 = sand.u32 1, %s752_s15  }
 0x1b3   : > { %s510_s5 = scalar_lea.sflag [#allocation4], %s509_s30 }
 0x1b4   : > { %p642_p1 = pnand %p645_p0, %p849_p8 }
 0x1b6   : > { %p643_p2 = pneg %p642_p1 }
 0x1b8   : > { %747 = dma.done.wait (%p643_p2), %s510_s5, 256  }
 0x1b9   : > { %749 = vsyncadd (%p643_p2), %s510_s5, 4294967040  ;;  %s17_s20 = sadd.s32 1, %s772_s20   ;;  %s932_s15 = smov %s756_s16 }
 0x1ba   : > { %p14_p3 = scmp.ge.s32.totalorder %s17_s20, 4   ;;  %s933_s16 = smov %s760_s17 }
 0x1bb   : > { %s934_s17 = smov %s855_s28  ;;  %s935_s18 = smov %s768_s19 }
 0x1bc   : > { %s936_s19 = smov %s938_s23  ;;  %16 = sbr.rel (!%p14_p3) target bundleno = 4 (0x4), region = 82 }
 0x1c1   :  { %515 = vsyncpa [#allocation4], 1 }
 0x1c2   :  { %517 = vsyncpa [#allocation4 + $0x1], 1 }

</bundles_post_ra>
